<compile_context>
chip_gen: v7x
topology: tpu7x:2x2x1
jax: 0.10.0
libtpu: 0.0.40
codegen_flags: <defaults>
</compile_context>

<pallas_src>
import functools

import jax
import jax.numpy as jnp
from jax.experimental import pallas as pl
from jax.experimental.pallas import tpu as pltpu


def _similarity_kernel(x_ref, y_ref, xn_ref, yn_ref, o_ref, *,
                       tm, tn, temp, p_adj, n_adj, do_ifm):
    # x_ref: (tm, D_pad) row tile    y_ref: (tn, D_pad) column tile
    # xn_ref: (tm, 1) f32 row norms  yn_ref: (1, tn) f32 column norms
    # o_ref: (tm, tn) f32 output tile

    # Pairwise dot products on the MXU; contract last dims directly (no y.T),
    # keep operand dtype (bf16 feeds the MXU at full rate), accumulate in f32.
    dots = jax.lax.dot_general(
        x_ref[...], y_ref[...],
        dimension_numbers=(((1,), (1,)), ((), ())),
        preferred_element_type=jnp.float32)                       # (tm, tn)

    # torch cosine_similarity denominator: max(||x||*||y||, 1e-8).
    denom = jnp.maximum(xn_ref[...] * yn_ref[...], jnp.float32(1e-8))

    # Fold 1/temp into the reciprocal so the epilogue is a single multiply.
    scale = pl.reciprocal(denom * jnp.float32(temp), approx=False)
    logits = dots * scale                                         # (tm, tn)

    if do_ifm and (p_adj != 0.0 or n_adj != 0.0):
        # Single iota-compare + select + add (adjustments pre-divided by temp).
        row = (jax.lax.broadcasted_iota(jnp.int32, (tm, tn), 0)
               + pl.program_id(0) * tm)
        col = (jax.lax.broadcasted_iota(jnp.int32, (tm, tn), 1)
               + pl.program_id(1) * tn)
        logits = logits + jnp.where(row == col,
                                    jnp.float32(p_adj), jnp.float32(n_adj))

    o_ref[...] = logits.astype(o_ref.dtype)


def _round_up(v, mult):
    return ((v + mult - 1) // mult) * mult


def similarity(x, y, temp, m=0.45, do_ifm=False,
               ifm_type='p-n+', ifm_logit_type='constant',
               tm=256, tn=256):
    """Pallas equivalent of Similarity(temp)(x, y, ...).

    Accepts x of shape (N, 1, D) or (N, D) and y of shape (1, N, D) or (N, D),
    returns (N, N) float32 logits, matching the PyTorch broadcasting semantics.
    """
    if do_ifm and ifm_logit_type != 'constant':
        # TODO(synk): 'dynamic'/'softmax' epsilon need the full detached diagonal /
        # row softmax across all column tiles; only 'constant' is implemented.
        raise NotImplementedError(
            f"ifm_logit_type={ifm_logit_type!r} is not implemented in the Pallas kernel")

    # ---- glue: collapse the broadcast axes to 2-D ----
    if x.ndim == 3:
        x = jnp.squeeze(x, axis=1)
    if y.ndim == 3:
        y = jnp.squeeze(y, axis=0)
    N, D = x.shape
    assert y.shape == (N, D)

    LANE = 128
    # Clamp tiles for small N, keep them multiples of 128.
    n_lane = _round_up(N, LANE)
    tm = min(tm, n_lane)
    tn = min(tn, n_lane)
    assert tm % LANE == 0 and tn % LANE == 0, "tiles must be multiples of 128"
    tile = max(tm, tn)
    assert tile % tm == 0 and tile % tn == 0, "tm/tn must divide each other"
    N_pad = _round_up(N, tile)
    D_pad = _round_up(D, LANE)

    # Row norms computed ONCE (hoisted out of the grid loop), in f32.
    xn = jnp.sqrt(jnp.sum(x.astype(jnp.float32) ** 2, axis=-1, keepdims=True))  # (N,1)
    yn = jnp.sqrt(jnp.sum(y.astype(jnp.float32) ** 2, axis=-1, keepdims=True))  # (N,1)

    # Zero-pad embeddings (zeros do not perturb dots); pad norms with ones
    # (padded rows/cols are sliced away at the end).
    x_p = jnp.zeros((N_pad, D_pad), x.dtype).at[:N, :D].set(x)
    y_p = jnp.zeros((N_pad, D_pad), y.dtype).at[:N, :D].set(y)
    xn_p = jnp.ones((N_pad, 1), jnp.float32).at[:N, :].set(xn)
    yn_p = jnp.ones((1, N_pad), jnp.float32).at[:, :N].set(yn.T)

    # Pre-resolve the (constant) IFM adjustments, already divided by temp.
    p_adj = 0.0
    n_adj = 0.0
    if do_ifm:
        eps = float(m)
        if 'p-' in ifm_type:
            p_adj = -eps
        elif 'p+' in ifm_type:
            p_adj = eps
        if 'n-' in ifm_type:
            n_adj = -eps
        elif 'n+' in ifm_type:
            n_adj = eps
        p_adj /= float(temp)
        n_adj /= float(temp)

    kernel = functools.partial(
        _similarity_kernel, tm=tm, tn=tn, temp=float(temp),
        p_adj=p_adj, n_adj=n_adj, do_ifm=bool(do_ifm))

    out = pl.pallas_call(
        kernel,
        out_shape=jax.ShapeDtypeStruct((N_pad, N_pad), jnp.float32),
        grid_spec=pltpu.PrefetchScalarGridSpec(
            num_scalar_prefetch=0,
            grid=(N_pad // tm, N_pad // tn),
            in_specs=[
                pl.BlockSpec((tm, D_pad), lambda i, j: (i, 0)),   # x row tile
                pl.BlockSpec((tn, D_pad), lambda i, j: (j, 0)),   # y col tile
                pl.BlockSpec((tm, 1), lambda i, j: (i, 0)),       # ||x|| rows
                pl.BlockSpec((1, tn), lambda i, j: (0, j)),       # ||y|| cols
            ],
            out_specs=pl.BlockSpec((tm, tn), lambda i, j: (i, j)),
        ),
        compiler_params=pltpu.CompilerParams(
            dimension_semantics=("parallel", "parallel")),
    )(x_p, y_p, xn_p, yn_p)

    return out[:N, :N]


def _reference(x, y, temp, m=0.45, do_ifm=False,
               ifm_type='p-n+', ifm_logit_type='constant'):
    """Pure-JAX reference mirroring the PyTorch forward (constant epsilon)."""
    if x.ndim == 3:
        x = jnp.squeeze(x, axis=1)
    if y.ndim == 3:
        y = jnp.squeeze(y, axis=0)
    N = x.shape[0]
    x = x.astype(jnp.float32)
    y = y.astype(jnp.float32)
    dots = x @ y.T
    xn = jnp.linalg.norm(x, axis=-1, keepdims=True)
    yn = jnp.linalg.norm(y, axis=-1, keepdims=True)
    logits = dots / jnp.maximum(xn * yn.T, 1e-8)
    if do_ifm:
        mask = jnp.eye(N, dtype=logits.dtype)
        eps = jnp.float32(m)
        if 'p-' in ifm_type:
            logits = logits - eps * mask
        elif 'p+' in ifm_type:
            logits = logits + eps * mask
        if 'n-' in ifm_type:
            logits = logits - eps * (1 - mask)
        elif 'n+' in ifm_type:
            logits = logits + eps * (1 - mask)
    return logits / temp


if __name__ == "__main__":
    key = jax.random.PRNGKey(0)
    kx, ky = jax.random.split(key)

    N, D = 16, 64
    temp = 0.05

    # Same layout as the SimCSE-style caller: x (N,1,D), y (1,N,D)
    x = jax.random.normal(kx, (N, 1, D), dtype=jnp.float32)
    y = jax.random.normal(ky, (1, N, D), dtype=jnp.float32)

    # Default path: plain cosine-similarity / temp
    out = similarity(x, y, temp)
    out = jax.block_until_ready(out)
    ref = _reference(x, y, temp)
    assert out.shape == (N, N)
    assert jnp.allclose(out, ref, atol=1e-4, rtol=1e-4)

    # IFM path (constant epsilon, default ifm_type='p-n+')
    out_ifm = similarity(x, y, temp, m=0.45, do_ifm=True)
    out_ifm = jax.block_until_ready(out_ifm)
    ref_ifm = _reference(x, y, temp, m=0.45, do_ifm=True)
    assert jnp.allclose(out_ifm, ref_ifm, atol=1e-4, rtol=1e-4)

    print("KERNEL_OK")
</pallas_src>

<mosaic_0001>
module attributes {stable_mosaic.version = 11 : i64} {
  func.func @_similarity_kernel(%arg0: i32, %arg1: i32, %arg2: memref<128x128xf32, #tpu.memory_space<vmem>>, %arg3: memref<128x128xf32, #tpu.memory_space<vmem>>, %arg4: memref<128x1xf32, #tpu.memory_space<vmem>>, %arg5: memref<1x128xf32, #tpu.memory_space<vmem>>, %arg6: memref<128x128xf32, #tpu.memory_space<vmem>>) attributes {dimension_semantics = [#tpu.dimension_semantics<parallel>, #tpu.dimension_semantics<parallel>], iteration_bounds = array<i64: 1, 1>, scalar_prefetch = 0 : i64, scratch_operands = 0 : i64, tpu.core_type = #tpu.core_type<tc>, window_params = [{transform_indices = @transform_0, window_bounds = array<i64: 128, 128>}, {transform_indices = @transform_1, window_bounds = array<i64: 128, 128>}, {transform_indices = @transform_2, window_bounds = array<i64: 128, 1>}, {transform_indices = @transform_3, window_bounds = array<i64: 1, 128>}, {transform_indices = @transform_4, window_bounds = array<i64: 128, 128>}]} {
    %c0 = arith.constant 0 : index
    %c0_0 = arith.constant 0 : index
    %0 = vector.load %arg2[%c0, %c0_0] : memref<128x128xf32, #tpu.memory_space<vmem>>, vector<128x128xf32>
    %c0_1 = arith.constant 0 : index
    %c0_2 = arith.constant 0 : index
    %1 = vector.load %arg3[%c0_1, %c0_2] : memref<128x128xf32, #tpu.memory_space<vmem>>, vector<128x128xf32>
    %cst = arith.constant dense<0.000000e+00> : vector<128x128xf32>
    %2 = tpu.matmul %0, %1, %cst {dimension_numbers = #tpu.dot_dimension_numbers<[1], [1], [0], [0], [0, 0, 1, 0], [], []>} : vector<128x128xf32>, vector<128x128xf32>, vector<128x128xf32> -> vector<128x128xf32>
    %c0_3 = arith.constant 0 : index
    %c0_4 = arith.constant 0 : index
    %3 = vector.load %arg4[%c0_3, %c0_4] : memref<128x1xf32, #tpu.memory_space<vmem>>, vector<128x1xf32>
    %c0_5 = arith.constant 0 : index
    %c0_6 = arith.constant 0 : index
    %4 = vector.load %arg5[%c0_5, %c0_6] : memref<1x128xf32, #tpu.memory_space<vmem>>, vector<1x128xf32>
    %5 = vector.broadcast %3 : vector<128x1xf32> to vector<128x128xf32>
    %6 = vector.broadcast %4 : vector<1x128xf32> to vector<128x128xf32>
    %7 = arith.mulf %5, %6 : vector<128x128xf32>
    %cst_7 = arith.constant 9.99999993E-9 : f32
    %8 = vector.broadcast %cst_7 : f32 to vector<128x128xf32>
    %9 = arith.maximumf %7, %8 : vector<128x128xf32>
    %cst_8 = arith.constant 5.000000e-02 : f32
    %10 = vector.broadcast %cst_8 : f32 to vector<128x128xf32>
    %11 = arith.mulf %9, %10 : vector<128x128xf32>
    %12 = tpu.reciprocal %11 : vector<128x128xf32> -> vector<128x128xf32>
    %13 = arith.mulf %2, %12 : vector<128x128xf32>
    %c0_9 = arith.constant 0 : index
    %c0_10 = arith.constant 0 : index
    %14 = vector.load %arg6[%c0_9, %c0_10] : memref<128x128xf32, #tpu.memory_space<vmem>>, vector<128x128xf32>
    tpu.vector_store %arg6[%c0_9, %c0_10], %13 {strides = array<i32>} : memref<128x128xf32, #tpu.memory_space<vmem>>, vector<128x128xf32>,
    return
  }
  func.func @transform_0(%arg0: i32, %arg1: i32) -> (i32, i32) {
    %c0_i32 = arith.constant 0 : i32
    %c0_i32_0 = arith.constant 0 : i32
    return %arg0, %c0_i32 : i32, i32
  }
  func.func @transform_1(%arg0: i32, %arg1: i32) -> (i32, i32) {
    %c0_i32 = arith.constant 0 : i32
    %c0_i32_0 = arith.constant 0 : i32
    return %arg1, %c0_i32 : i32, i32
  }
  func.func @transform_2(%arg0: i32, %arg1: i32) -> (i32, i32) {
    %c0_i32 = arith.constant 0 : i32
    %c0_i32_0 = arith.constant 0 : i32
    return %arg0, %c0_i32 : i32, i32
  }
  func.func @transform_3(%arg0: i32, %arg1: i32) -> (i32, i32) {
    %c0_i32 = arith.constant 0 : i32
    %c0_i32_0 = arith.constant 0 : i32
    return %c0_i32, %arg1 : i32, i32
  }
  func.func @transform_4(%arg0: i32, %arg1: i32) -> (i32, i32) {
    %c0_i32 = arith.constant 0 : i32
    return %arg0, %arg1 : i32, i32
  }
}

</mosaic_0001>

<bundles_post_ra>
// kernel: tpu_custom_call.1
= control target key start
LH: loop header
LB: loop body
LE: loop exit
PB: predicated region body
PF: predicated region fallthrough
CT: control target
= control target key end

     0   :  { %9 = vsyncpa [#allocation3], 0  ;;  %s808_s0 = inlined_call_operand.vmem [shape: f32[128,128], index: 0, kind: input, shape index: {}]   ;;  %s809_s1 = inlined_call_operand.hbm [shape: f32[128,128], index: 1, kind: input, shape index: {}]   ;;  %s810_s2 = inlined_call_operand.vmem [shape: f32[128,1], index: 2, kind: input, shape index: {}]   ;;  %s811_s3 = inlined_call_operand.vmem [shape: f32[1,128], index: 3, kind: input, shape index: {}]   ;;  %s812_s4 = inlined_call_operand.hbm [shape: f32[128,128], index: 4, kind: output, shape index: {}]  }
   0x1   :  { %10 = vsyncpa [#allocation4], 0  ;;  %s649_s15 = smov [#allocation2]   ;;  %s601_s19 = scalar_lea.hbm %s809_s1, 2048 }
   0x2   :  { %s18_s16 = sshll.u32 %s649_s15, 4  ;;  %p602_p0 = scmp.ne.s32.totalorder %s809_s1, %s601_s19  ;;  %s19_s16 = int_to_ptr.vmem [resolvable:$true] %s18_s16 }
   0x3   :  { %p605_p1 = scmp.lt.u32.totalorder %s601_s19, %s809_s1 }
   0x5   :  { %p607_p2 = pnand %p605_p1, %p602_p0 }
   0x7   :  { %610 = shalt.err (!%p607_p2)
}
   0x8   :  { %s611_s24 = scalar_lea.vmem %s19_s16, 2048  ;;  %p616_p4 = scmp.lt.s32.totalorder %s19_s16, %s19_s16 }
   0x9   :  { %p612_p3 = scmp.ne.s32.totalorder %s19_s16, %s611_s24  ;;  %p617_p5 = scmp.lt.s32.totalorder %s611_s24, %s611_s24 }
   0xb   :  { %p618_p6 = por %p617_p5, %p616_p4 }
   0xd   :  { %p619_p7 = pnand %p618_p6, %p612_p3 }
   0xf   :  { %622 = shalt.err (!%p619_p7)
}
  0x10   :  { %s650_s25 = smov 128   ;;  %s651_s26 = smov 8  }
  0x11   :  { %24 = dma.hbm_to_vmem [thread:$0]  %s809_s1, 2048, %s19_s16, [#allocation3], %s650_s25, %s650_s25, %s651_s26  }
  0x12   :  { %645 = dma.done.wait [#allocation3], 2048  }
  0x13   :  { %646 = vsyncadd [#allocation3], 4294965248  ;;  %v652_v0 = vmov 0   ;;  %v48_v1 = vld [vmem:[#allocation2] sm:$0xff]  ;;  %v49_v2 = vld [vmem:[#allocation2 + $0x8] sm:$0xff] }
  0x14   :  { %568 = vset.pattern.permute.xlu1 %v652_v0  ;;  %567 = vset.pattern.permute.xlu0 %v652_v0  ;;  %v50_v3 = vld [vmem:[#allocation2 + $0x10] sm:$0xff]  ;;  %v514_v4 = vpack.c.bf16 %v49_v2, %v48_v1  ;;  %v51_v5 = vld [vmem:[#allocation2 + $0x18] sm:$0xff]  ;;  %v32_v7 = vld [vmem:[%s808_s0] sm:$0xff] }
  0x15   :  { %v518_v6 = vpack.c.bf16 %v51_v5, %v50_v3  ;;  %v40_v8 = vld [vmem:[%s808_s0 + $0x40] sm:$0xff]  ;;  %v53_v10 = vld [vmem:[#allocation2 + $0x28] sm:$0xff]  ;;  %490 = vmatprep.mubr.f32.mxu0 %v32_v7  ;;  %v211_v12 = vld [vmem:[%s810_s2 + $0x10] sm:$0xff] }
  0x16   :  { %515 = vmatprep.subr.bf16.mxu0 %v514_v4  ;;  %546 = vmatprep.subr.bf16.mxu1 %v514_v4  ;;  %v52_v9 = vld [vmem:[#allocation2 + $0x20] sm:$0xff]  ;;  %v212_v14 = vld [vmem:[%s810_s2 + $0x18] sm:$0xff]  ;;  %v54_v15 = vld [vmem:[#allocation2 + $0x30] sm:$0xff] }
  0x17   :  { %517 = vmatpush3.bf16.xpose.msra.mxu0 %v514_v4  ;;  %554 = vmatpush3.bf16.xpose.msra.mxu1 %v514_v4  ;;  %v522_v11 = vpack.c.bf16 %v53_v10, %v52_v9  ;;  %v209_v13 = vld [vmem:[%s810_s2] sm:$0xff]  ;;  %v55_v16 = vld [vmem:[#allocation2 + $0x38] sm:$0xff]  ;;  %v210_v17 = vld [vmem:[%s810_s2 + $0x8] sm:$0xff] }
  0x18   :  { %519 = vmatprep.subr.bf16.mxu0 %v518_v6  ;;  %547 = vmatprep.subr.bf16.mxu1 %v518_v6  ;;  %v214_v18 = vld [vmem:[%s810_s2 + $0x28] sm:$0xff]  ;;  %v526_v19 = vpack.c.bf16 %v55_v16, %v54_v15  ;;  %v213_v20 = vld [vmem:[%s810_s2 + $0x20] sm:$0xff]  ;;  %v216_v21 = vld [vmem:[%s810_s2 + $0x38] sm:$0xff] }
  0x19   :  { %502 = vmatprep.mubr.f32.mxu1 %v40_v8  ;;  %238 = vperm.xlu1 %568, %v211_v12   ;;  %v56_v22 = vld [vmem:[#allocation2 + $0x40] sm:$0xff]  ;;  %v57_v23 = vld [vmem:[#allocation2 + $0x48] sm:$0xff]  ;;  %v215_v24 = vld [vmem:[%s810_s2 + $0x30] sm:$0xff] }
  0x1a   :  { %228 = vperm.xlu0 %567, %v209_v13   ;;  %v218_v25 = vld [vmem:[%s810_s2 + $0x48] sm:$0xff]  ;;  %v530_v26 = vpack.c.bf16 %v57_v23, %v56_v22  ;;  %v217_v27 = vld [vmem:[%s810_s2 + $0x40] sm:$0xff]  ;;  %v220_v28 = vld [vmem:[%s810_s2 + $0x58] sm:$0xff] }
  0x1b   :  { %v58_v29 = vld [vmem:[#allocation2 + $0x50] sm:$0xff]  ;;  %v59_v30 = vld [vmem:[#allocation2 + $0x58] sm:$0xff]  ;;  %v222_v32 = vld [vmem:[%s810_s2 + $0x68] sm:$0xff] }
  0x1c   :  { %v219_v31 = vld [vmem:[%s810_s2 + $0x50] sm:$0xff]  ;;  %v534_v33 = vpack.c.bf16 %v59_v30, %v58_v29  ;;  %v221_v34 = vld [vmem:[%s810_s2 + $0x60] sm:$0xff]  ;;  %v224_v35 = vld [vmem:[%s810_s2 + $0x78] sm:$0xff] }
  0x1d   :  { %243 = vperm.xlu1 %568, %v212_v14   ;;  %v60_v36 = vld [vmem:[#allocation2 + $0x60] sm:$0xff]  ;;  %v61_v37 = vld [vmem:[#allocation2 + $0x68] sm:$0xff]  ;;  %v223_v38 = vld [vmem:[%s810_s2 + $0x70] sm:$0xff] }
  0x1e   :  { %233 = vperm.xlu0 %567, %v210_v17   ;;  %v538_v39 = vpack.c.bf16 %v61_v37, %v60_v36  ;;  %v62_v40 = vld [vmem:[#allocation2 + $0x70] sm:$0xff]  ;;  %v63_v41 = vld [vmem:[#allocation2 + $0x78] sm:$0xff]  ;;  %v33_v43 = vld [vmem:[%s808_s0 + $0x8] sm:$0xff] }
  0x1f   :  { %521 = vmatpush3.bf16.xpose.msra.mxu0 %v518_v6  ;;  %555 = vmatpush3.bf16.xpose.msra.mxu1 %v518_v6  ;;  %v542_v42 = vpack.c.bf16 %v63_v41, %v62_v40  ;;  %v41_v44 = vld [vmem:[%s808_s0 + $0x48] sm:$0xff]  ;;  %v34_v45 = vld [vmem:[%s808_s0 + $0x10] sm:$0xff]  ;;  %v35_v47 = vld [vmem:[%s808_s0 + $0x18] sm:$0xff] }
  0x20   :  { %523 = vmatprep.subr.bf16.mxu0 %v522_v11  ;;  %548 = vmatprep.subr.bf16.mxu1 %v522_v11  ;;  %v42_v46 = vld [vmem:[%s808_s0 + $0x50] sm:$0xff]  ;;  %v43_v48 = vld [vmem:[%s808_s0 + $0x58] sm:$0xff]  ;;  %v36_v49 = vld [vmem:[%s808_s0 + $0x20] sm:$0xff] }
  0x21   :  { %253 = vperm.xlu1 %568, %v214_v18   ;;  %v44_v50 = vld [vmem:[%s808_s0 + $0x60] sm:$0xff]  ;;  %v37_v51 = vld [vmem:[%s808_s0 + $0x28] sm:$0xff]  ;;  %v38_v53 = vld [vmem:[%s808_s0 + $0x30] sm:$0xff] }
  0x22   :  { %248 = vperm.xlu0 %567, %v213_v20   ;;  %v45_v52 = vld [vmem:[%s808_s0 + $0x68] sm:$0xff]  ;;  %v46_v54 = vld [vmem:[%s808_s0 + $0x70] sm:$0xff]  ;;  %v39_v55 = vld [vmem:[%s808_s0 + $0x38] sm:$0xff] }
  0x23   :  { %v47_v56 = vld [vmem:[%s808_s0 + $0x78] sm:$0xff]  ;;  %v425_v3 = vld [vmem:[%s811_s3] ss:$0 sm:$0xff]  ;;  %s653_s0 = smov [#allocation5]  }
  0x24   :  { %s413_s3 = sshll.u32 %s653_s0, 4  ;;  %s414_s3 = int_to_ptr.vmem [resolvable:$true] %s413_s3 }
  0x25   :  { %263 = vperm.xlu1 %568, %v216_v21   ;;  %s623_s16 = scalar_lea.vmem %s414_s3, 2048  ;;  %p628_p9 = scmp.lt.s32.totalorder %s414_s3, %s414_s3 }
  0x26   :  { %258 = vperm.xlu0 %567, %v215_v24   ;;  %p624_p8 = scmp.ne.s32.totalorder %s414_s3, %s623_s16  ;;  %p629_p10 = scmp.lt.s32.totalorder %s623_s16, %s623_s16 }
  0x27   :  { %525 = vmatpush3.bf16.xpose.msra.mxu0 %v522_v11  ;;  %556 = vmatpush3.bf16.xpose.msra.mxu1 %v522_v11 }
  0x28   :  { %527 = vmatprep.subr.bf16.mxu0 %v526_v19  ;;  %549 = vmatprep.subr.bf16.mxu1 %v526_v19  ;;  %p630_p11 = por %p629_p10, %p628_p9 }
  0x29   :  { %273 = vperm.xlu1 %568, %v218_v25  }
  0x2a   :  { %268 = vperm.xlu0 %567, %v217_v27   ;;  %p631_p12 = pnand %p630_p11, %p624_p8 }
  0x2d   :  { %283 = vperm.xlu1 %568, %v220_v28  }
  0x2e   :  { %278 = vperm.xlu0 %567, %v219_v31  }
  0x2f   :  { %529 = vmatpush3.bf16.xpose.msra.mxu0 %v526_v19  ;;  %557 = vmatpush3.bf16.xpose.msra.mxu1 %v526_v19 }
  0x30   :  { %531 = vmatprep.subr.bf16.mxu0 %v530_v26  ;;  %550 = vmatprep.subr.bf16.mxu1 %v530_v26 }
  0x31   :  { %293 = vperm.xlu1 %568, %v222_v32  }
  0x32   :  { %288 = vperm.xlu0 %567, %v221_v34  }
  0x35   :  { %303 = vperm.xlu1 %568, %v224_v35  }
  0x36   :  { %298 = vperm.xlu0 %567, %v223_v38  }
  0x37   :  { %533 = vmatpush3.bf16.xpose.msra.mxu0 %v530_v26  ;;  %558 = vmatpush3.bf16.xpose.msra.mxu1 %v530_v26 }
  0x38   :  { %535 = vmatprep.subr.bf16.mxu0 %v534_v33  ;;  %551 = vmatprep.subr.bf16.mxu1 %v534_v33 }
  0x3f   :  { %537 = vmatpush3.bf16.xpose.msra.mxu0 %v534_v33  ;;  %559 = vmatpush3.bf16.xpose.msra.mxu1 %v534_v33 }
  0x40   :  { %539 = vmatprep.subr.bf16.mxu0 %v538_v39  ;;  %552 = vmatprep.subr.bf16.mxu1 %v538_v39 }
  0x47   :  { %541 = vmatpush3.bf16.xpose.msra.mxu0 %v538_v39  ;;  %560 = vmatpush3.bf16.xpose.msra.mxu1 %v538_v39 }
  0x48   :  { %543 = vmatprep.subr.bf16.mxu0 %v542_v42  ;;  %553 = vmatprep.subr.bf16.mxu1 %v542_v42 }
  0x4f   :  { %545 = vmatpush3.bf16.xpose.msra.mxu0 %v542_v42  ;;  %561 = vmatpush3.bf16.xpose.msra.mxu1 %v542_v42 }
  0x56   :  { %491 = vmatmul.mubr.f32.vlgmr.msra.gmra.mrb[0].mxu0 %v33_v43  ;;  %503 = vmatmul.mubr.f32.vlgmr.msra.gmra.mrb[0].mxu1 %v41_v44 }
  0x57   :  { %493 = vmatprep.mubr.f32.mxu0 %v34_v45  ;;  %505 = vmatprep.mubr.f32.mxu1 %v42_v46 }
  0x5a   :  { %494 = vmatmul.mubr.f32.gmra.mrb[2].mxu0 %v35_v47  ;;  %506 = vmatmul.mubr.f32.gmra.mrb[2].mxu1 %v43_v48 }
  0x5b   :  { %496 = vmatprep.mubr.f32.mxu0 %v36_v49  ;;  %508 = vmatprep.mubr.f32.mxu1 %v44_v50 }
  0x5e   :  { %497 = vmatmul.mubr.f32.gmra.mrb[4].mxu0 %v37_v51  ;;  %509 = vmatmul.mubr.f32.gmra.mrb[4].mxu1 %v45_v52 }
  0x5f   :  { %499 = vmatprep.mubr.f32.mxu0 %v38_v53  ;;  %511 = vmatprep.mubr.f32.mxu1 %v46_v54 }
  0x62   :  { %500 = vmatmul.mubr.f32.gmra.mrb[6].mxu0 %v39_v55  ;;  %512 = vmatmul.mubr.f32.gmra.mrb[6].mxu1 %v47_v56 }
  0x98   :  { %v239_v57 = vpop.permute.xlu1 %238 }
  0x99   :  { %v229_v58 = vpop.permute.xlu0 %228  ;;  %v314_v10 = vmul.f32 %v425_v3, %v239_v57 }
  0x9a   :  { %v312_v5 = vmul.f32 %v425_v3, %v229_v58 }
  0x9b   :  { %v330_v20 = vmax.f32 %v314_v10, 1e-08 }
  0x9c   :  { %v244_v59 = vpop.permute.xlu1 %243  ;;  %v328_v11 = vmax.f32 %v312_v5, 1e-08 }
  0x9d   :  { %v234_v60 = vpop.permute.xlu0 %233  ;;  %v315_v12 = vmul.f32 %v425_v3, %v244_v59  ;;  %v346_v33 = vmul.f32 0.05, %v330_v20 }
  0x9e   :  { %v313_v7 = vmul.f32 %v425_v3, %v234_v60  ;;  %v344_v21 = vmul.f32 0.05, %v328_v11 }
  0x9f   :  { %v331_v23 = vmax.f32 %v315_v12, 1e-08 }
  0xa0   :  { %v254_v61 = vpop.permute.xlu1 %253  ;;  %v329_v13 = vmax.f32 %v313_v7, 1e-08  ;;  %569 = vrcp.f32 %v344_v21 }
  0xa1   :  { %v249_v62 = vpop.permute.xlu0 %248  ;;  %v317_v22 = vmul.f32 %v425_v3, %v254_v61  ;;  %v347_v37 = vmul.f32 0.05, %v331_v23 }
  0xa2   :  { %v345_v24 = vmul.f32 0.05, %v329_v13  ;;  %v316_v25 = vmul.f32 %v425_v3, %v249_v62 }
  0xa3   :  { %v333_v34 = vmax.f32 %v317_v22, 1e-08 }
  0xa4   :  { %v264_v63 = vpop.permute.xlu1 %263  ;;  %571 = vrcp.f32 %v345_v24  ;;  %v332_v38 = vmax.f32 %v316_v25, 1e-08 }
  0xa5   :  { %v259_v0 = vpop.permute.xlu0 %258  ;;  %v319_v35 = vmul.f32 %v425_v3, %v264_v63  ;;  %v349_v46 = vmul.f32 0.05, %v333_v34 }
  0xa6   :  { %v318_v39 = vmul.f32 %v425_v3, %v259_v0  ;;  %v348_v48 = vmul.f32 0.05, %v332_v38 }
  0xa7   :  { %v335_v47 = vmax.f32 %v319_v35, 1e-08 }
  0xa8   :  { %v274_v1 = vpop.permute.xlu1 %273  ;;  %v334_v49 = vmax.f32 %v318_v39, 1e-08 }
  0xa9   :  { %v269_v2 = vpop.permute.xlu0 %268  ;;  %v321_v8 = vmul.f32 %v425_v3, %v274_v1  ;;  %v351_v54 = vmul.f32 0.05, %v335_v47 }
  0xaa   :  { %v320_v9 = vmul.f32 %v425_v3, %v269_v2  ;;  %v350_v55 = vmul.f32 0.05, %v334_v49  ;;  %v570_v56 = vpop.eup %569 }
  0xab   :  { %v337_v15 = vmax.f32 %v321_v8, 1e-08 }
  0xac   :  { %v284_v4 = vpop.permute.xlu1 %283  ;;  %v336_v18 = vmax.f32 %v320_v9, 1e-08 }
  0xad   :  { %v279_v6 = vpop.permute.xlu0 %278  ;;  %v323_v16 = vmul.f32 %v425_v3, %v284_v4  ;;  %v353_v26 = vmul.f32 0.05, %v337_v15 }
  0xae   :  { %v322_v19 = vmul.f32 %v425_v3, %v279_v6  ;;  %v352_v29 = vmul.f32 0.05, %v336_v18  ;;  %v572_v58 = vpop.eup %571 }
  0xaf   :  { %v339_v27 = vmax.f32 %v323_v16, 1e-08  ;;  %573 = vrcp.f32 %v353_v26 }
  0xb0   :  { %v294_v14 = vpop.permute.xlu1 %293  ;;  %v338_v30 = vmax.f32 %v322_v19, 1e-08  ;;  %575 = vrcp.f32 %v352_v29 }
  0xb1   :  { %v289_v17 = vpop.permute.xlu0 %288  ;;  %v325_v28 = vmul.f32 %v425_v3, %v294_v14  ;;  %v355_v40 = vmul.f32 0.05, %v339_v27  ;;  %577 = vrcp.f32 %v346_v33 }
  0xb2   :  { %v324_v31 = vmul.f32 %v425_v3, %v289_v17  ;;  %v354_v43 = vmul.f32 0.05, %v338_v30  ;;  %579 = vrcp.f32 %v347_v37 }
  0xb3   :  { %v341_v41 = vmax.f32 %v325_v28, 1e-08  ;;  %581 = vrcp.f32 %v355_v40 }
  0xb4   :  { %v304_v32 = vpop.permute.xlu1 %303  ;;  %v340_v44 = vmax.f32 %v324_v31, 1e-08  ;;  %583 = vrcp.f32 %v354_v43 }
  0xb5   :  { %v299_v36 = vpop.permute.xlu0 %298  ;;  %v327_v42 = vmul.f32 %v425_v3, %v304_v32  ;;  %v357_v50 = vmul.f32 0.05, %v341_v41  ;;  %585 = vrcp.f32 %v349_v46 }
  0xb6   :  { %v326_v45 = vmul.f32 %v425_v3, %v299_v36  ;;  %v356_v52 = vmul.f32 0.05, %v340_v44  ;;  %587 = vrcp.f32 %v348_v48 }
  0xb7   :  { %v343_v51 = vmax.f32 %v327_v42, 1e-08  ;;  %589 = vrcp.f32 %v357_v50 }
  0xb8   :  { %v342_v53 = vmax.f32 %v326_v45, 1e-08  ;;  %591 = vrcp.f32 %v356_v52 }
  0xb9   :  { %v359_v57 = vmul.f32 0.05, %v343_v51  ;;  %v574_v60 = vpop.eup %573  ;;  %593 = vrcp.f32 %v351_v54 }
  0xba   :  { %v358_v59 = vmul.f32 0.05, %v342_v53  ;;  %v576_v63 = vpop.eup %575  ;;  %595 = vrcp.f32 %v350_v55 }
  0xbb   :  { %v578_v4 = vpop.eup %577  ;;  %597 = vrcp.f32 %v359_v57 }
  0xbc   :  { %v580_v7 = vpop.eup %579  ;;  %599 = vrcp.f32 %v358_v59 }
  0xbd   :  { %v582_v8 = vpop.eup %581 }
  0xbe   :  { %v584_v11 = vpop.eup %583 }
  0xbf   :  { %v586_v16 = vpop.eup %585 }
  0xc0   :  { %v588_v19 = vpop.eup %587 }
  0xc1   :  { %v590_v20 = vpop.eup %589 }
  0xc2   :  { %v592_v23 = vpop.eup %591 }
  0xc3   :  { %v594_v28 = vpop.eup %593 }
  0xc4   :  { %v596_v31 = vpop.eup %595 }
  0xc5   :  { %v598_v32 = vpop.eup %597 }
  0xc6   :  { %v600_v35 = vpop.eup %599 }
 0x129   :  { %v492_v61 = vpop.f32.mrb[0].mxu0  ;;  %v504_v62 = vpop.f32.mrb[0].mxu1 }
 0x12a   :  { %v377_v0 = vmul.f32 %v572_v58, %v492_v61  ;;  %v385_v1 = vmul.f32 %v574_v60, %v504_v62  ;;  %v130_v2 = vpop.f32.mrb[1].mxu0  ;;  %v170_v3 = vpop.f32.mrb[1].mxu1 }
 0x12b   :  { %v376_v5 = vmul.f32 %v570_v56, %v130_v2  ;;  %v384_v6 = vmul.f32 %v576_v63, %v170_v3 }
 0x12c   :  { %393 = vst [vmem:[#allocation5 + $0x8] sm:$0xff] %v377_v0  ;;  %401 = vst [vmem:[#allocation5 + $0x48] sm:$0xff] %v385_v1 }
 0x12d   :  { %392 = vst [vmem:[#allocation5] sm:$0xff] %v376_v5  ;;  %400 = vst [vmem:[#allocation5 + $0x40] sm:$0xff] %v384_v6  ;;  %v495_v9 = vpop.f32.mrb[2].mxu0  ;;  %v507_v10 = vpop.f32.mrb[2].mxu1 }
 0x12e   :  { %v379_v12 = vmul.f32 %v580_v7, %v495_v9  ;;  %v387_v13 = vmul.f32 %v582_v8, %v507_v10  ;;  %v140_v14 = vpop.f32.mrb[3].mxu0  ;;  %v180_v15 = vpop.f32.mrb[3].mxu1 }
 0x12f   :  { %v378_v17 = vmul.f32 %v578_v4, %v140_v14  ;;  %v386_v18 = vmul.f32 %v584_v11, %v180_v15 }
 0x130   :  { %395 = vst [vmem:[#allocation5 + $0x18] sm:$0xff] %v379_v12  ;;  %403 = vst [vmem:[#allocation5 + $0x58] sm:$0xff] %v387_v13 }
 0x131   :  { %394 = vst [vmem:[#allocation5 + $0x10] sm:$0xff] %v378_v17  ;;  %402 = vst [vmem:[#allocation5 + $0x50] sm:$0xff] %v386_v18  ;;  %v498_v21 = vpop.f32.mrb[4].mxu0  ;;  %v510_v22 = vpop.f32.mrb[4].mxu1 }
 0x132   :  { %v381_v24 = vmul.f32 %v586_v16, %v498_v21  ;;  %v389_v25 = vmul.f32 %v590_v20, %v510_v22  ;;  %v150_v26 = vpop.f32.mrb[5].mxu0  ;;  %v190_v27 = vpop.f32.mrb[5].mxu1 }
 0x133   :  { %v380_v29 = vmul.f32 %v588_v19, %v150_v26  ;;  %v388_v30 = vmul.f32 %v592_v23, %v190_v27 }
 0x134   :  { %397 = vst [vmem:[#allocation5 + $0x28] sm:$0xff] %v381_v24  ;;  %405 = vst [vmem:[#allocation5 + $0x68] sm:$0xff] %v389_v25 }
 0x135   :  { %396 = vst [vmem:[#allocation5 + $0x20] sm:$0xff] %v380_v29  ;;  %404 = vst [vmem:[#allocation5 + $0x60] sm:$0xff] %v388_v30  ;;  %v501_v33 = vpop.f32.mrb[6].mxu0  ;;  %v513_v34 = vpop.f32.mrb[6].mxu1 }
 0x136   :  { %v383_v36 = vmul.f32 %v594_v28, %v501_v33  ;;  %v391_v37 = vmul.f32 %v598_v32, %v513_v34  ;;  %v160_v38 = vpop.f32.mrb[7].mxu0  ;;  %v200_v39 = vpop.f32.mrb[7].mxu1 }
 0x137   :  { %v382_v40 = vmul.f32 %v596_v31, %v160_v38  ;;  %v390_v41 = vmul.f32 %v600_v35, %v200_v39 }
 0x138   :  { %399 = vst [vmem:[#allocation5 + $0x38] sm:$0xff] %v383_v36  ;;  %407 = vst [vmem:[#allocation5 + $0x78] sm:$0xff] %v391_v37 }
 0x139   :  { %398 = vst [vmem:[#allocation5 + $0x30] sm:$0xff] %v382_v40  ;;  %406 = vst [vmem:[#allocation5 + $0x70] sm:$0xff] %v390_v41 }
 0x13a   :  { %634 = shalt.err (!%p631_p12)
}
 0x13b   :  { %s635_s19 = scalar_lea.hbm %s812_s4, 2048 }
 0x13c   :  { %p636_p13 = scmp.ne.s32.totalorder %s812_s4, %s635_s19  ;;  %p639_p0 = scmp.lt.u32.totalorder %s635_s19, %s812_s4 }
 0x13e   :  { %p641_p1 = pnand %p639_p0, %p636_p13 }
 0x140   :  { %644 = shalt.err (!%p641_p1)
}
 0x141   :  { %419 = dma.vmem_to_hbm [thread:$0]  %s414_s3, 2048, %s812_s4, [#allocation4], %s650_s25, %s650_s25, %s651_s26  }
 0x142   :  { %647 = dma.done.wait [#allocation4], 2048  }
 0x143   :  { %648 = vsyncadd [#allocation4], 4294965248 }
 0x144   :  { %423 = vsyncpa [#allocation3], 1 }
 0x145   :  { %424 = vsyncpa [#allocation4], 1 }

</bundles_post_ra>
